<compile_context>
chip_gen: v7x
topology: tpu7x:2x2x1
jax: 0.10.0
libtpu: 0.0.40
codegen_flags: <defaults>
</compile_context>

<pallas_src>
import jax
import jax.numpy as jnp
from jax import lax
from jax.experimental import pallas as pl
from jax.experimental.pallas import tpu as pltpu

TEMPERATURE = 0.5
LANE = 128
MAX_BLOCK_ROWS = 4096  # (4096, 128) f32 tile = 2 MiB -> ~8 MiB double-buffered in+out


def _round_up(x, m):
    return (x + m - 1) // m * m


def _hash_u32(x):
    """lowbias32 finalizer: stateless per-element uint32 -> uint32 hash."""
    x = x ^ (x >> jnp.uint32(16))
    x = x * jnp.uint32(0x7FEB352D)
    x = x ^ (x >> jnp.uint32(15))
    x = x * jnp.uint32(0x846CA68B)
    x = x ^ (x >> jnp.uint32(16))
    return x


def _gate_from_bits(bits_u32, sig_d):
    """uniform [0,1) from random bits, then the concrete-Bernoulli gate."""
    # 23 random mantissa bits, exponent forced to 1.0  ->  u in [1, 2) - 1
    mant = (bits_u32 >> jnp.uint32(9)) | jnp.uint32(0x3F800000)
    u = lax.bitcast_convert_type(mant, jnp.float32) - 1.0
    # z = sigmoid(dropout) + log(u / (1 - u)); a = sigmoid(z / temperature)
    z = sig_d + jnp.log(u / (1.0 - u))          # single log per element
    return jax.nn.sigmoid(z * (1.0 / TEMPERATURE))


def _bernoulli_dropout_kernel(seed_ref, sig_ref, x_ref, o_ref):
    rows, lanes = x_ref.shape
    i = pl.program_id(0)

    # Stateless counter-based RNG: global flat element index mixed with the seed.
    row = lax.broadcasted_iota(jnp.int32, (rows, lanes), 0)
    col = lax.broadcasted_iota(jnp.int32, (rows, lanes), 1)
    idx = (i * rows + row) * lanes + col                       # int32 wraps OK (hash input)
    key = idx ^ (seed_ref[0] * jnp.int32(0x6A09E667))          # mix user seed (scalar SMEM)
    bits = _hash_u32(lax.bitcast_convert_type(key, jnp.uint32))

    a = _gate_from_bits(bits, sig_ref[0])                      # sig_ref[0] = sigmoid(dropout)
    o_ref[...] = (x_ref[...].astype(jnp.float32) * a).astype(o_ref.dtype)


def bernoulli_dropout(x, dropout, seed, *, training=True):
    """Pallas implementation of BernoulliDropout.forward.

    x:       any-shape float array (e.g. NCHW conv activations).
    dropout: shape-(1,) float32 (the module's `dropout` parameter).
    seed:    shape-(1,) int32 seed for the stateless in-kernel PRNG.
    """
    if not training:
        return x

    orig_shape = x.shape
    total = x.size

    flat = jnp.ravel(x)                        # keep original dtype (no f32 copy)
    padded = _round_up(total, 8 * LANE)
    pad = padded - total
    if pad:                                    # only pay the pad copy when needed
        flat = jnp.pad(flat, (0, pad))
    rows = padded // LANE
    block_rows = min(MAX_BLOCK_ROWS, rows)     # rows is a multiple of 8
    x2d = flat.reshape(rows, LANE)

    # Hoisted scalar transcendental: sigmoid(dropout) computed once, passed via SMEM.
    sig_d = jax.nn.sigmoid(dropout.astype(jnp.float32)).reshape(1)
    seed_i32 = seed.astype(jnp.int32).reshape(1)

    grid = (pl.cdiv(rows, block_rows),)
    out2d = pl.pallas_call(
        _bernoulli_dropout_kernel,
        out_shape=jax.ShapeDtypeStruct((rows, LANE), x.dtype),
        grid=grid,
        in_specs=[
            pl.BlockSpec(memory_space=pltpu.MemorySpace.SMEM),    # seed
            pl.BlockSpec(memory_space=pltpu.MemorySpace.SMEM),    # sigmoid(dropout)
            pl.BlockSpec((block_rows, LANE), lambda i: (i, 0)),   # x tile
        ],
        out_specs=pl.BlockSpec((block_rows, LANE), lambda i: (i, 0)),
        compiler_params=pltpu.CompilerParams(
            # Stateless RNG -> no cross-step dependency; lets v7x shard across both TCs.
            dimension_semantics=("parallel",),
        ),
    )(seed_i32, sig_d, x2d)

    if pad:
        out = out2d.reshape(-1)[:total].reshape(orig_shape)
    else:
        out = out2d.reshape(orig_shape)
    return out


def bernoulli_dropout_reference(x, dropout, seed):
    """Pure-JAX reference using the identical hash/gate math (for validation)."""
    total = x.size
    padded = _round_up(total, 8 * LANE)
    idx = jnp.arange(padded, dtype=jnp.int32)
    key = idx ^ (seed.astype(jnp.int32)[0] * jnp.int32(0x6A09E667))
    bits = _hash_u32(lax.bitcast_convert_type(key, jnp.uint32))
    a = _gate_from_bits(bits, jax.nn.sigmoid(dropout.astype(jnp.float32))[0])
    a = a[:total].reshape(x.shape)
    return (x.astype(jnp.float32) * a).astype(x.dtype)


if __name__ == "__main__":
    key = jax.random.PRNGKey(0)
    x = jax.random.normal(key, (2, 4, 16, 16), dtype=jnp.float32)  # NCHW
    dropout = jnp.array([0.3], dtype=jnp.float32)  # the module's `dropout` param
    seed = jnp.array([0], dtype=jnp.int32)

    # training path (runs the Pallas kernel)
    y = bernoulli_dropout(x, dropout, seed, training=True)
    jax.block_until_ready(y)

    # eval path (identity, per the module)
    y_eval = bernoulli_dropout(x, dropout, seed, training=False)
    jax.block_until_ready(y_eval)

    y_ref = bernoulli_dropout_reference(x, dropout, seed)

    assert y.shape == x.shape and y.dtype == x.dtype
    # gate a = sigmoid(.) is in [0, 1], so |y| <= |x| elementwise
    assert bool(jnp.all(jnp.abs(y) <= jnp.abs(x) + 1e-5))
    assert bool(jnp.all(y_eval == x))
    # kernel matches the pure-JAX reference with the same RNG
    assert bool(jnp.allclose(y, y_ref, atol=1e-3, rtol=1e-3))

    print("KERNEL_OK")
</pallas_src>

<mosaic_0001>
module attributes {stable_mosaic.version = 11 : i64} {
  func.func @_bernoulli_dropout_kernel(%arg0: i32, %arg1: memref<1xi32, #tpu.memory_space<smem>>, %arg2: memref<1xf32, #tpu.memory_space<smem>>, %arg3: memref<16x128xf32, #tpu.memory_space<vmem>>, %arg4: memref<16x128xf32, #tpu.memory_space<vmem>>) attributes {dimension_semantics = [#tpu.dimension_semantics<parallel>], iteration_bounds = array<i64: 1>, scalar_prefetch = 0 : i64, scratch_operands = 0 : i64, tpu.core_type = #tpu.core_type<tc>, window_params = [{transform_indices = @transform_0, window_bounds = array<i64: 1>}, {transform_indices = @transform_1, window_bounds = array<i64: 1>}, {transform_indices = @transform_2, window_bounds = array<i64: 16, 128>}, {transform_indices = @transform_3, window_bounds = array<i64: 16, 128>}]} {
    %0 = tpu.iota {dimensions = array<i32: 0>} : vector<16x128xi32>
    %1 = tpu.iota {dimensions = array<i32: 1>} : vector<16x128xi32>
    %c16_i32 = arith.constant 16 : i32
    %2 = arith.muli %arg0, %c16_i32 : i32
    %3 = vector.broadcast %2 : i32 to vector<16x128xi32>
    %4 = arith.addi %3, %0 : vector<16x128xi32>
    %c128_i32 = arith.constant 128 : i32
    %5 = vector.broadcast %c128_i32 : i32 to vector<16x128xi32>
    %6 = arith.muli %4, %5 : vector<16x128xi32>
    %7 = arith.addi %6, %1 : vector<16x128xi32>
    %c0 = arith.constant 0 : index
    %8 = memref.load %arg1[%c0] : memref<1xi32, #tpu.memory_space<smem>>
    %c1779033703_i32 = arith.constant 1779033703 : i32
    %9 = arith.muli %8, %c1779033703_i32 : i32
    %10 = vector.broadcast %9 : i32 to vector<16x128xi32>
    %11 = arith.xori %7, %10 : vector<16x128xi32>
    %12 = tpu.bitcast %11 : vector<16x128xi32> -> vector<16x128xi32>
    %c16_i32_0 = arith.constant 16 : i32
    %13 = vector.broadcast %c16_i32_0 : i32 to vector<16x128xi32>
    %14 = arith.shrui %12, %13 : vector<16x128xi32>
    %15 = arith.xori %12, %14 : vector<16x128xi32>
    %c2146121005_i32 = arith.constant 2146121005 : i32
    %16 = vector.broadcast %c2146121005_i32 : i32 to vector<16x128xi32>
    %17 = arith.muli %15, %16 : vector<16x128xi32>
    %c15_i32 = arith.constant 15 : i32
    %18 = vector.broadcast %c15_i32 : i32 to vector<16x128xi32>
    %19 = arith.shrui %17, %18 : vector<16x128xi32>
    %20 = arith.xori %17, %19 : vector<16x128xi32>
    %c-2073254261_i32 = arith.constant -2073254261 : i32
    %21 = vector.broadcast %c-2073254261_i32 : i32 to vector<16x128xi32>
    %22 = arith.muli %20, %21 : vector<16x128xi32>
    %c16_i32_1 = arith.constant 16 : i32
    %23 = vector.broadcast %c16_i32_1 : i32 to vector<16x128xi32>
    %24 = arith.shrui %22, %23 : vector<16x128xi32>
    %25 = arith.xori %22, %24 : vector<16x128xi32>
    %c0_2 = arith.constant 0 : index
    %26 = memref.load %arg2[%c0_2] : memref<1xf32, #tpu.memory_space<smem>>
    %c9_i32 = arith.constant 9 : i32
    %27 = vector.broadcast %c9_i32 : i32 to vector<16x128xi32>
    %28 = arith.shrui %25, %27 : vector<16x128xi32>
    %c1065353216_i32 = arith.constant 1065353216 : i32
    %29 = vector.broadcast %c1065353216_i32 : i32 to vector<16x128xi32>
    %30 = arith.ori %28, %29 : vector<16x128xi32>
    %31 = tpu.bitcast %30 : vector<16x128xi32> -> vector<16x128xf32>
    %cst = arith.constant 1.000000e+00 : f32
    %32 = vector.broadcast %cst : f32 to vector<16x128xf32>
    %33 = arith.subf %31, %32 : vector<16x128xf32>
    %cst_3 = arith.constant 1.000000e+00 : f32
    %34 = vector.broadcast %cst_3 : f32 to vector<16x128xf32>
    %35 = arith.subf %34, %33 : vector<16x128xf32>
    %36 = arith.divf %33, %35 : vector<16x128xf32>
    %37 = math.log %36 : vector<16x128xf32>
    %38 = vector.broadcast %26 : f32 to vector<16x128xf32>
    %39 = arith.addf %38, %37 : vector<16x128xf32>
    %cst_4 = arith.constant 2.000000e+00 : f32
    %40 = vector.broadcast %cst_4 : f32 to vector<16x128xf32>
    %41 = arith.mulf %39, %40 : vector<16x128xf32>
    %42 = arith.negf %41 : vector<16x128xf32>
    %43 = math.exp %42 : vector<16x128xf32>
    %cst_5 = arith.constant 1.000000e+00 : f32
    %44 = vector.broadcast %cst_5 : f32 to vector<16x128xf32>
    %45 = arith.addf %44, %43 : vector<16x128xf32>
    %46 = arith.divf %44, %45 : vector<16x128xf32>
    %c0_6 = arith.constant 0 : index
    %c0_7 = arith.constant 0 : index
    %47 = vector.load %arg3[%c0_6, %c0_7] : memref<16x128xf32, #tpu.memory_space<vmem>>, vector<16x128xf32>
    %48 = arith.mulf %47, %46 : vector<16x128xf32>
    %c0_8 = arith.constant 0 : index
    %c0_9 = arith.constant 0 : index
    %49 = vector.load %arg4[%c0_8, %c0_9] : memref<16x128xf32, #tpu.memory_space<vmem>>, vector<16x128xf32>
    tpu.vector_store %arg4[%c0_8, %c0_9], %48 {strides = array<i32>} : memref<16x128xf32, #tpu.memory_space<vmem>>, vector<16x128xf32>,
    return
  }
  func.func @transform_0(%arg0: i32) -> i32 {
    %c0_i32 = arith.constant 0 : i32
    %c0_i32_0 = arith.constant 0 : i32
    return %c0_i32 : i32
  }
  func.func @transform_1(%arg0: i32) -> i32 {
    %c0_i32 = arith.constant 0 : i32
    %c0_i32_0 = arith.constant 0 : i32
    return %c0_i32 : i32
  }
  func.func @transform_2(%arg0: i32) -> (i32, i32) {
    %c0_i32 = arith.constant 0 : i32
    %c0_i32_0 = arith.constant 0 : i32
    return %arg0, %c0_i32 : i32, i32
  }
  func.func @transform_3(%arg0: i32) -> (i32, i32) {
    %c0_i32 = arith.constant 0 : i32
    %c0_i32_0 = arith.constant 0 : i32
    return %arg0, %c0_i32 : i32, i32
  }
}

</mosaic_0001>

<bundles_post_ra>
// kernel: tpu_custom_call.1
= control target key start
LH: loop header
LB: loop body
LE: loop exit
PB: predicated region body
PF: predicated region fallthrough
CT: control target
= control target key end

     0   :  { %10 = vsyncpa [#allocation5], 0  ;;  %s256_s0 = inlined_call_operand.<no memory space> [shape: s32[1], index: 0, kind: input, shape index: {}]   ;;  %s257_s1 = inlined_call_operand.<no memory space> [shape: f32[1], index: 1, kind: input, shape index: {}]   ;;  %s258_s2 = inlined_call_operand.hbm [shape: f32[16,128], index: 2, kind: input, shape index: {}]   ;;  %s259_s3 = inlined_call_operand.hbm [shape: f32[16,128], index: 3, kind: output, shape index: {}]  }
   0x1   :  { %11 = vsyncpa [#allocation6], 0  ;;  %s196_s12 = smov [#allocation4]   ;;  %s148_s16 = scalar_lea.hbm %s258_s2, 256 }
   0x2   :  { %s21_s13 = sshll.u32 %s196_s12, 4  ;;  %p149_p0 = scmp.ne.s32.totalorder %s258_s2, %s148_s16  ;;  %s22_s13 = int_to_ptr.vmem [resolvable:$true] %s21_s13 }
   0x3   :  { %p152_p1 = scmp.lt.u32.totalorder %s148_s16, %s258_s2 }
   0x5   :  { %p154_p2 = pnand %p152_p1, %p149_p0 }
   0x7   :  { %157 = shalt.err (!%p154_p2)
}
   0x8   :  { %s158_s21 = scalar_lea.vmem %s22_s13, 256  ;;  %p163_p4 = scmp.lt.s32.totalorder %s22_s13, %s22_s13 }
   0x9   :  { %p159_p3 = scmp.ne.s32.totalorder %s22_s13, %s158_s21  ;;  %p164_p5 = scmp.lt.s32.totalorder %s158_s21, %s158_s21 }
   0xb   :  { %p165_p6 = por %p164_p5, %p163_p4 }
   0xd   :  { %p166_p7 = pnand %p165_p6, %p159_p3 }
   0xf   :  { %169 = shalt.err (!%p166_p7)
}
  0x10   :  { %s197_s22 = smov 128   ;;  %s198_s23 = smov 8  }
  0x11   :  { %27 = dma.hbm_to_vmem [thread:$0]  %s258_s2, 256, %s22_s13, [#allocation5], %s197_s22, %s197_s22, %s198_s23  }
  0x12   :  { %192 = dma.done.wait [#allocation5], 256  }
  0x13   :  { %193 = vsyncadd [#allocation5], 4294967040  ;;  %v31_v0 = vlaneseq  ;;  %s45_s28 = smul.u32 1779033703, %s256_s0  ;;  %v84_v40 = vstv %s257_s1  ;;  %v101_v54 = vld [vmem:[#allocation4] sm:$0xff]  ;;  %v102_v56 = vld [vmem:[#allocation4 + $0x8] sm:$0xff] }
  0x14   :  { %s199_s1 = smov [#allocation7]  }
  0x15   :  { %v32_v1 = vshrl.u32 %v31_v0, 7  ;;  %v35_v2 = vand.u32 127, %v31_v0  ;;  %v46_v5 = vstv %s45_s28  ;;  %s112_s29 = sshll.u32 %s199_s1, 4  ;;  %s113_s29 = int_to_ptr.vmem [resolvable:$true] %s112_s29 }
  0x16   :  { %s170_s30 = scalar_lea.vmem %s113_s29, 256  ;;  %p175_p9 = scmp.lt.s32.totalorder %s113_s29, %s113_s29 }
  0x17   :  { %v40_v3 = vmul.u32 128, %v32_v1  ;;  %v33_v4 = vadd.s32 8, %v32_v1  ;;  %p171_p8 = scmp.ne.s32.totalorder %s113_s29, %s170_s30  ;;  %p176_p10 = scmp.lt.s32.totalorder %s170_s30, %s170_s30 }
  0x19   :  { %v42_v6 = vadd.s32 %v40_v3, %v35_v2  ;;  %v41_v7 = vmul.u32 128, %v33_v4  ;;  %p177_p11 = por %p176_p10, %p175_p9 }
  0x1b   :  { %v47_v8 = vxor.u32 %v46_v5, %v42_v6  ;;  %v43_v9 = vadd.s32 %v41_v7, %v35_v2  ;;  %p178_p12 = pnand %p177_p11, %p171_p8 }
  0x1d   :  { %v49_v10 = vshrl.u32 %v47_v8, 16  ;;  %v48_v11 = vxor.u32 %v46_v5, %v43_v9 }
  0x1f   :  { %v51_v12 = vxor.u32 %v49_v10, %v47_v8  ;;  %v50_v13 = vshrl.u32 %v48_v11, 16 }
  0x21   :  { %v53_v14 = vmul.u32 2146121005, %v51_v12  ;;  %v52_v15 = vxor.u32 %v50_v13, %v48_v11 }
  0x23   :  { %v55_v16 = vshrl.u32 %v53_v14, 15  ;;  %v54_v17 = vmul.u32 2146121005, %v52_v15 }
  0x25   :  { %v57_v18 = vxor.u32 %v55_v16, %v53_v14  ;;  %v56_v19 = vshrl.u32 %v54_v17, 15 }
  0x27   :  { %v59_v20 = vmul.u32 2221713035, %v57_v18  ;;  %v58_v21 = vxor.u32 %v56_v19, %v54_v17 }
  0x29   :  { %v61_v22 = vshrl.u32 %v59_v20, 16  ;;  %v60_v23 = vmul.u32 2221713035, %v58_v21 }
  0x2b   :  { %v63_v24 = vxor.u32 %v61_v22, %v59_v20  ;;  %v62_v25 = vshrl.u32 %v60_v23, 16 }
  0x2d   :  { %v66_v26 = vshrl.u32 %v63_v24, 9  ;;  %v64_v27 = vxor.u32 %v62_v25, %v60_v23 }
  0x2f   :  { %v68_v28 = vor.u32 1065353216, %v66_v26  ;;  %v67_v29 = vshrl.u32 %v64_v27, 9 }
  0x31   :  { %v124_v30 = vadd.f32 -1.0, %v68_v28  ;;  %v69_v31 = vor.u32 1065353216, %v67_v29 }
  0x33   :  { %v74_v32 = vsub.f32 1.0, %v124_v30  ;;  %v125_v33 = vadd.f32 -1.0, %v69_v31 }
  0x35   :  { %132 = vrcp.f32 %v74_v32  ;;  %v75_v34 = vsub.f32 1.0, %v125_v33 }
  0x37   :  { %134 = vrcp.f32 %v75_v34 }
  0x3f   :  { %v133_v35 = vpop.eup %132 }
  0x40   :  { %v77_v36 = vmul.f32 %v133_v35, %v124_v30 }
  0x41   :  { %v135_v37 = vpop.eup %134 }
  0x42   :  { %136 = vlog2.f32 %v77_v36  ;;  %v79_v38 = vmul.f32 %v135_v37, %v125_v33 }
  0x44   :  { %138 = vlog2.f32 %v79_v38 }
  0x4c   :  { %v137_v39 = vpop.eup %136 }
  0x4d   :  { %v81_v41 = vmul.f32 0.6931472, %v137_v39 }
  0x4e   :  { %v139_v42 = vpop.eup %138 }
  0x4f   :  { %v85_v43 = vadd.f32 %v84_v40, %v81_v41  ;;  %v83_v44 = vmul.f32 0.6931472, %v139_v42 }
  0x51   :  { %v126_v45 = vmul.f32 -2.0, %v85_v43  ;;  %v86_v46 = vadd.f32 %v84_v40, %v83_v44 }
  0x53   :  { %v91_v47 = vmul.f32 1.442695, %v126_v45  ;;  %v127_v48 = vmul.f32 -2.0, %v86_v46 }
  0x55   :  { %140 = vpow2.f32 %v91_v47  ;;  %v93_v49 = vmul.f32 1.442695, %v127_v48 }
  0x57   :  { %142 = vpow2.f32 %v93_v49 }
  0x5f   :  { %v141_v50 = vpop.eup %140 }
  0x60   :  { %v95_v51 = vadd.f32 1.0, %v141_v50 }
  0x61   :  { %v143_v52 = vpop.eup %142 }
  0x62   :  { %144 = vrcp.f32 %v95_v51  ;;  %v96_v53 = vadd.f32 1.0, %v143_v52 }
  0x64   :  { %146 = vrcp.f32 %v96_v53 }
  0x6c   :  { %v145_v55 = vpop.eup %144 }
  0x6d   :  { %v103_v57 = vmul.f32 %v145_v55, %v101_v54 }
  0x6e   :  { %v147_v58 = vpop.eup %146 }
  0x6f   :  { %105 = vst [vmem:[#allocation7] sm:$0xff] %v103_v57  ;;  %v104_v59 = vmul.f32 %v147_v58, %v102_v56 }
  0x71   :  { %106 = vst [vmem:[#allocation7 + $0x8] sm:$0xff] %v104_v59 }
  0x72   :  { %181 = shalt.err (!%p178_p12)
}
  0x73   :  { %s182_s6 = scalar_lea.hbm %s259_s3, 256 }
  0x74   :  { %p183_p13 = scmp.ne.s32.totalorder %s259_s3, %s182_s6  ;;  %p186_p0 = scmp.lt.u32.totalorder %s182_s6, %s259_s3 }
  0x76   :  { %p188_p1 = pnand %p186_p0, %p183_p13 }
  0x78   :  { %191 = shalt.err (!%p188_p1)
}
  0x79   :  { %118 = dma.vmem_to_hbm [thread:$0]  %s113_s29, 256, %s259_s3, [#allocation6], %s197_s22, %s197_s22, %s198_s23  }
  0x7a   :  { %194 = dma.done.wait [#allocation6], 256  }
  0x7b   :  { %195 = vsyncadd [#allocation6], 4294967040 }
  0x7c   :  { %122 = vsyncpa [#allocation5], 1 }
  0x7d   :  { %123 = vsyncpa [#allocation6], 1 }

</bundles_post_ra>
